<compile_context>
chip_gen: v7x
topology: tpu7x:2x2x1
jax: 0.10.0
libtpu: 0.0.40
codegen_flags: <defaults>
</compile_context>

<pallas_src>
import functools

import jax
import jax.numpy as jnp
from jax.experimental import pallas as pl
from jax.experimental.pallas import tpu as pltpu


# --------------------------------------------------------------------------
# Kernel: LayerNorm over the last dim
#   torch semantics of the reference module:
#     mean = x.mean(-1); std = x.std(-1)  (unbiased, divide by F-1)
#     out  = scale * (x - mean) / (std + eps) + shift
# --------------------------------------------------------------------------
def _layernorm_kernel(x_ref, scale_ref, shift_ref, o_ref, *, epsilon, features):
    # Stats in float32 regardless of activation dtype.
    x = x_ref[...].astype(jnp.float32)                      # (TR, F)
    mean = jnp.mean(x, axis=-1, keepdims=True)              # (TR, 1)
    diff = x - mean
    # Bessel's correction (divide by F-1); eps is added to std (not variance).
    var = jnp.sum(diff * diff, axis=-1, keepdims=True) * jnp.float32(
        1.0 / (features - 1))
    std = jnp.sqrt(var)
    # Per-row reciprocal on the (TR, 1) column -> EUP slot; the remaining
    # per-element work is two broadcast multiplies + add on the VPU.
    inv = pl.reciprocal(std + jnp.float32(epsilon), approx=False)  # (TR, 1)
    scale = scale_ref[...].astype(jnp.float32)               # (1, F)
    shift = shift_ref[...].astype(jnp.float32)                # (1, F)
    o_ref[...] = (diff * (scale * inv) + shift).astype(o_ref.dtype)


def _pick_row_tile(rows, features, itemsize, vmem_limit_bytes, max_tile=1024):
    """Largest row tile that (a) divides `rows`, (b) respects the sublane
    tiling rule for the dtype, and (c) keeps the double-buffered in/out tiles
    comfortably inside the scoped-VMEM budget."""
    # 2 (input) + 2 (output) pipelined buffers of (row_tile, F); params are
    # negligible.  Keep ~30% headroom.
    budget = int(0.7 * vmem_limit_bytes)
    cap = max(1, budget // max(1, 4 * features * itemsize))
    sub = 8 if itemsize >= 4 else 16          # bf16/fp16 need 16-row sublane tiles
    cand = sub
    best = None
    while cand <= min(max_tile, cap, rows):
        if rows % cand == 0:
            best = cand
        cand *= 2
    if best is not None:
        return best
    # Fallback: a single full-extent block is always layout-legal.
    return rows


def layernorm_pallas(x, scale, shift, *, epsilon=1e-6,
                     vmem_limit_bytes=32 * 1024 * 1024):
    orig_shape = x.shape
    F = orig_shape[-1]
    R = 1
    for d in orig_shape[:-1]:
        R *= d
    x2 = x.reshape(R, F)

    row_tile = _pick_row_tile(R, F, jnp.dtype(x.dtype).itemsize,
                              vmem_limit_bytes)
    grid = (pl.cdiv(R, row_tile),)

    kernel = functools.partial(_layernorm_kernel, epsilon=epsilon, features=F)
    out2 = pl.pallas_call(
        kernel,
        out_shape=jax.ShapeDtypeStruct((R, F), x.dtype),
        grid_spec=pltpu.PrefetchScalarGridSpec(
            num_scalar_prefetch=0,
            grid=grid,
            in_specs=[
                pl.BlockSpec((row_tile, F), lambda i: (i, 0)),
                pl.BlockSpec((1, F), lambda i: (0, 0)),
                pl.BlockSpec((1, F), lambda i: (0, 0)),
            ],
            out_specs=pl.BlockSpec((row_tile, F), lambda i: (i, 0)),
        ),
        compiler_params=pltpu.CompilerParams(
            # Row tiles are fully independent -> let v7x shard across both TCs.
            dimension_semantics=("parallel",),
            vmem_limit_bytes=vmem_limit_bytes,
        ),
    )(x2, scale.reshape(1, F), shift.reshape(1, F))
    return out2.reshape(orig_shape)


# --------------------------------------------------------------------------
if __name__ == "__main__":
    key = jax.random.PRNGKey(0)

    B, S, F = 2, 8, 32          # batch=2, seq=8, features=32
    epsilon = 1e-6

    x = jax.random.normal(key, (B, S, F), dtype=jnp.float32)

    # LayerNorm parameters (as in __init__: ones / zeros).  Use non-trivial
    # values so the affine path is actually exercised.
    scale = jnp.ones((F,), dtype=jnp.float32) * 1.5
    shift = jnp.full((F,), 0.25, dtype=jnp.float32)

    out = layernorm_pallas(x, scale, shift, epsilon=epsilon)
    out = jax.block_until_ready(out)

    # Pure-JAX reference with identical semantics (unbiased std, eps on std).
    mean = jnp.mean(x, axis=-1, keepdims=True)
    var = jnp.sum((x - mean) ** 2, axis=-1, keepdims=True) / (F - 1)
    std = jnp.sqrt(var)
    ref = scale * (x - mean) / (std + epsilon) + shift

    assert out.shape == (B, S, F)
    assert jnp.allclose(out, ref, atol=1e-5, rtol=1e-5), "mismatch vs reference"

    print("KERNEL_OK")
</pallas_src>

<mosaic_0001>
module attributes {stable_mosaic.version = 11 : i64} {
  func.func @_layernorm_kernel(%arg0: i32, %arg1: memref<16x32xf32, #tpu.memory_space<vmem>>, %arg2: memref<1x32xf32, #tpu.memory_space<vmem>>, %arg3: memref<1x32xf32, #tpu.memory_space<vmem>>, %arg4: memref<16x32xf32, #tpu.memory_space<vmem>>) attributes {dimension_semantics = [#tpu.dimension_semantics<parallel>], iteration_bounds = array<i64: 1>, scalar_prefetch = 0 : i64, scratch_operands = 0 : i64, tpu.core_type = #tpu.core_type<tc>, window_params = [{transform_indices = @transform_0, window_bounds = array<i64: 16, 32>}, {pipeline_mode = #tpu.pipeline_mode<synchronous>, transform_indices = @transform_1, window_bounds = array<i64: 1, 32>}, {pipeline_mode = #tpu.pipeline_mode<synchronous>, transform_indices = @transform_2, window_bounds = array<i64: 1, 32>}, {transform_indices = @transform_3, window_bounds = array<i64: 16, 32>}]} {
    %c0 = arith.constant 0 : index
    %c0_0 = arith.constant 0 : index
    %0 = vector.load %arg1[%c0, %c0_0] : memref<16x32xf32, #tpu.memory_space<vmem>>, vector<16x32xf32>
    %cst = arith.constant dense<0.000000e+00> : vector<16xf32>
    %1 = vector.multi_reduction <add>, %0, %cst [1] : vector<16x32xf32> to vector<16xf32>
    %2 = vector.shape_cast %1 : vector<16xf32> to vector<16x1xf32>
    %cst_1 = arith.constant 3.200000e+01 : f32
    %3 = vector.broadcast %cst_1 : f32 to vector<16x1xf32>
    %4 = arith.divf %2, %3 : vector<16x1xf32>
    %5 = vector.broadcast %4 : vector<16x1xf32> to vector<16x32xf32>
    %6 = arith.subf %0, %5 : vector<16x32xf32>
    %7 = arith.mulf %6, %6 : vector<16x32xf32>
    %cst_2 = arith.constant dense<0.000000e+00> : vector<16xf32>
    %8 = vector.multi_reduction <add>, %7, %cst_2 [1] : vector<16x32xf32> to vector<16xf32>
    %9 = vector.shape_cast %8 : vector<16xf32> to vector<16x1xf32>
    %cst_3 = arith.constant 0.0322580636 : f32
    %10 = vector.broadcast %cst_3 : f32 to vector<16x1xf32>
    %11 = arith.mulf %9, %10 : vector<16x1xf32>
    %12 = math.sqrt %11 : vector<16x1xf32>
    %cst_4 = arith.constant 9.99999997E-7 : f32
    %13 = vector.broadcast %cst_4 : f32 to vector<16x1xf32>
    %14 = arith.addf %12, %13 : vector<16x1xf32>
    %15 = tpu.reciprocal %14 : vector<16x1xf32> -> vector<16x1xf32>
    %c0_5 = arith.constant 0 : index
    %c0_6 = arith.constant 0 : index
    %16 = vector.load %arg2[%c0_5, %c0_6] : memref<1x32xf32, #tpu.memory_space<vmem>>, vector<1x32xf32>
    %c0_7 = arith.constant 0 : index
    %c0_8 = arith.constant 0 : index
    %17 = vector.load %arg3[%c0_7, %c0_8] : memref<1x32xf32, #tpu.memory_space<vmem>>, vector<1x32xf32>
    %18 = vector.broadcast %16 : vector<1x32xf32> to vector<16x32xf32>
    %19 = vector.broadcast %15 : vector<16x1xf32> to vector<16x32xf32>
    %20 = arith.mulf %18, %19 : vector<16x32xf32>
    %21 = arith.mulf %6, %20 : vector<16x32xf32>
    %22 = vector.broadcast %17 : vector<1x32xf32> to vector<16x32xf32>
    %23 = arith.addf %21, %22 : vector<16x32xf32>
    %c0_9 = arith.constant 0 : index
    %c0_10 = arith.constant 0 : index
    %24 = vector.load %arg4[%c0_9, %c0_10] : memref<16x32xf32, #tpu.memory_space<vmem>>, vector<16x32xf32>
    tpu.vector_store %arg4[%c0_9, %c0_10], %23 {strides = array<i32>} : memref<16x32xf32, #tpu.memory_space<vmem>>, vector<16x32xf32>,
    return
  }
  func.func @transform_0(%arg0: i32) -> (i32, i32) {
    %c0_i32 = arith.constant 0 : i32
    %c0_i32_0 = arith.constant 0 : i32
    return %arg0, %c0_i32 : i32, i32
  }
  func.func @transform_1(%arg0: i32) -> (i32, i32) {
    %c0_i32 = arith.constant 0 : i32
    %c0_i32_0 = arith.constant 0 : i32
    %c0_i32_1 = arith.constant 0 : i32
    return %c0_i32, %c0_i32_0 : i32, i32
  }
  func.func @transform_2(%arg0: i32) -> (i32, i32) {
    %c0_i32 = arith.constant 0 : i32
    %c0_i32_0 = arith.constant 0 : i32
    %c0_i32_1 = arith.constant 0 : i32
    return %c0_i32, %c0_i32_0 : i32, i32
  }
  func.func @transform_3(%arg0: i32) -> (i32, i32) {
    %c0_i32 = arith.constant 0 : i32
    %c0_i32_0 = arith.constant 0 : i32
    return %arg0, %c0_i32 : i32, i32
  }
}

</mosaic_0001>

<bundles_post_ra>
// kernel: tpu_custom_call.1
= control target key start
LH: loop header
LB: loop body
LE: loop exit
PB: predicated region body
PF: predicated region fallthrough
CT: control target
= control target key end

     0   :  { %8 = vsyncpa [#allocation3], 0  ;;  %s238_s0 = inlined_call_operand.hbm [shape: f32[16,32], index: 0, kind: input, shape index: {}]   ;;  %s239_s1 = inlined_call_operand.vmem [shape: f32[1,32], index: 1, kind: input, shape index: {}]   ;;  %s240_s2 = inlined_call_operand.vmem [shape: f32[1,32], index: 2, kind: input, shape index: {}]   ;;  %s241_s3 = inlined_call_operand.hbm [shape: f32[16,32], index: 3, kind: output, shape index: {}]  }
   0x1   :  { %9 = vsyncpa [#allocation4], 0  ;;  %s172_s12 = smov [#allocation2]   ;;  %s124_s16 = scalar_lea.hbm %s238_s0, 256 }
   0x2   :  { %s15_s13 = sshll.u32 %s172_s12, 4  ;;  %p125_p0 = scmp.ne.s32.totalorder %s238_s0, %s124_s16  ;;  %s16_s13 = int_to_ptr.vmem [resolvable:$true] %s15_s13 }
   0x3   :  { %p128_p1 = scmp.lt.u32.totalorder %s124_s16, %s238_s0 }
   0x5   :  { %p130_p2 = pnand %p128_p1, %p125_p0 }
   0x7   :  { %133 = shalt.err (!%p130_p2)
}
   0x8   :  { %s134_s21 = scalar_lea.vmem %s16_s13, 256  ;;  %p139_p4 = scmp.lt.s32.totalorder %s16_s13, %s16_s13 }
   0x9   :  { %p135_p3 = scmp.ne.s32.totalorder %s16_s13, %s134_s21  ;;  %p140_p5 = scmp.lt.s32.totalorder %s134_s21, %s134_s21 }
   0xb   :  { %p141_p6 = por %p140_p5, %p139_p4 }
   0xd   :  { %p142_p7 = pnand %p141_p6, %p135_p3 }
   0xf   :  { %145 = shalt.err (!%p142_p7)
}
  0x10   :  { %s173_s22 = smov 128   ;;  %s174_s23 = smov 8  }
  0x11   :  { %21 = dma.hbm_to_vmem [thread:$0]  %s238_s0, 256, %s16_s13, [#allocation3], %s173_s22, %s173_s22, %s174_s23  }
  0x12   :  { %168 = dma.done.wait [#allocation3], 256  }
  0x13   :  { %169 = vsyncadd [#allocation3], 4294967040  ;;  %vm31_vm0 = vcmask 261120   ;;  %v29_v0 = vld [vmem:[#allocation2] sm:$0xff]  ;;  %v30_v1 = vld [vmem:[#allocation2 + $0x8] sm:$0xff]  ;;  %s175_s29 = smov [#allocation5]  }
  0x14   :  { %v32_v2 = vsel %vm31_vm0, %v29_v0, 0.0  ;;  %v35_v3 = vsel %vm31_vm0, %v30_v1, 0.0  ;;  %v110_v30 = vld [vmem:[%s239_s1] ss:$0 sm:$0xff]  ;;  %s98_s30 = sshll.u32 %s175_s29, 4  ;;  %s99_s30 = int_to_ptr.vmem [resolvable:$true] %s98_s30 }
  0x15   :  { %33 = vadd.xlane.f32.xlu0 %v32_v2  ;;  %v111_v33 = vld [vmem:[%s240_s2] ss:$0 sm:$0xff]  ;;  %s146_s1 = scalar_lea.vmem %s99_s30, 256  ;;  %p151_p9 = scmp.lt.s32.totalorder %s99_s30, %s99_s30 }
  0x16   :  { %p147_p8 = scmp.ne.s32.totalorder %s99_s30, %s146_s1  ;;  %p152_p10 = scmp.lt.s32.totalorder %s146_s1, %s146_s1 }
  0x18   :  { %p153_p11 = por %p152_p10, %p151_p9 }
  0x19   :  { %36 = vadd.xlane.f32.xlu0 %v35_v3 }
  0x1a   :  { %p154_p12 = pnand %p153_p11, %p147_p8 }
  0xa2   :  { %v34_v4 = vpop.xlane.xlu0 %33 }
  0xa3   :  { %v39_v5 = vmul.f32 0.03125, %v34_v4 }
  0xa5   :  { %v41_v6 = vsub.f32 %v29_v0, %v39_v5 }
  0xa6   :  { %v37_v7 = vpop.xlane.xlu0 %36 }
  0xa7   :  { %v40_v8 = vmul.f32 0.03125, %v37_v7  ;;  %v43_v9 = vmul.f32 %v41_v6, %v41_v6 }
  0xa9   :  { %v42_v10 = vsub.f32 %v30_v1, %v40_v8  ;;  %v45_v11 = vsel %vm31_vm0, %v43_v9, 0.0 }
  0xaa   :  { %46 = vadd.xlane.f32.xlu1 %v45_v11 }
  0xab   :  { %v44_v12 = vmul.f32 %v42_v10, %v42_v10 }
  0xad   :  { %v48_v13 = vsel %vm31_vm0, %v44_v12, 0.0 }
  0xae   :  { %49 = vadd.xlane.f32.xlu1 %v48_v13 }
 0x137   :  { %v47_v14 = vpop.xlane.xlu1 %46 }
 0x138   :  { %v51_v15 = vmul.f32 0.032258064, %v47_v14 }
 0x13a   :  { %116 = vrsqrt.f32 %v51_v15  ;;  %vm55_vm1 = vcmp.eq.f32.partialorder %v51_v15, inf  ;;  %v58_v20 = vand.u32 2147483648, %v51_v15  ;;  %vm57_vm2 = vcmp.eq.f32.partialorder %v51_v15, 0.0 }
 0x13b   :  { %v50_v16 = vpop.xlane.xlu1 %49 }
 0x13c   :  { %v52_v17 = vmul.f32 0.032258064, %v50_v16 }
 0x13e   :  { %118 = vrsqrt.f32 %v52_v17  ;;  %vm62_vm3 = vcmp.eq.f32.partialorder %v52_v17, inf  ;;  %v65_v26 = vand.u32 2147483648, %v52_v17  ;;  %vm64_vm4 = vcmp.eq.f32.partialorder %v52_v17, 0.0 }
 0x144   :  { %v117_v18 = vpop.eup %116 }
 0x145   :  { %v54_v19 = vmul.f32 %v117_v18, %v51_v15 }
 0x147   :  { %v56_v21 = vsel %vm55_vm1, %v51_v15, %v54_v19 }
 0x148   :  { %v119_v22 = vpop.eup %118  ;;  %v59_v23 = vsel %vm57_vm2, %v58_v20, %v56_v21 }
 0x149   :  { %v67_v24 = vadd.f32 1e-06, %v59_v23  ;;  %v61_v25 = vmul.f32 %v119_v22, %v52_v17 }
 0x14b   :  { %120 = vrcp.f32 %v67_v24  ;;  %v63_v27 = vsel %vm62_vm3, %v52_v17, %v61_v25 }
 0x14c   :  { %v66_v28 = vsel %vm64_vm4, %v65_v26, %v63_v27 }
 0x14d   :  { %v68_v29 = vadd.f32 1e-06, %v66_v28 }
 0x14f   :  { %122 = vrcp.f32 %v68_v29 }
 0x155   :  { %v121_v31 = vpop.eup %120 }
 0x156   :  { %v79_v32 = vmul.f32 %v121_v31, %v110_v30 }
 0x158   :  { %v81_v34 = vmul.f32 %v79_v32, %v41_v6 }
 0x159   :  { %v123_v35 = vpop.eup %122 }
 0x15a   :  { %v80_v36 = vmul.f32 %v123_v35, %v110_v30  ;;  %v89_v37 = vadd.f32 %v111_v33, %v81_v34 }
 0x15c   :  { %v82_v38 = vmul.f32 %v80_v36, %v42_v10  ;;  %91 = vst.msk [vmem:[#allocation5] sm:$0xff] %vm31_vm0, %v89_v37 }
 0x15e   :  { %v90_v39 = vadd.f32 %v111_v33, %v82_v38 }
 0x160   :  { %92 = vst.msk [vmem:[#allocation5 + $0x8] sm:$0xff] %vm31_vm0, %v90_v39 }
 0x161   :  { %157 = shalt.err (!%p154_p12)
}
 0x162   :  { %s158_s5 = scalar_lea.hbm %s241_s3, 256 }
 0x163   :  { %p159_p13 = scmp.ne.s32.totalorder %s241_s3, %s158_s5  ;;  %p162_p0 = scmp.lt.u32.totalorder %s158_s5, %s241_s3 }
 0x165   :  { %p164_p1 = pnand %p162_p0, %p159_p13 }
 0x167   :  { %167 = shalt.err (!%p164_p1)
}
 0x168   :  { %104 = dma.vmem_to_hbm [thread:$0]  %s99_s30, 256, %s241_s3, [#allocation4], %s173_s22, %s173_s22, %s174_s23  }
 0x169   :  { %170 = dma.done.wait [#allocation4], 256  }
 0x16a   :  { %171 = vsyncadd [#allocation4], 4294967040 }
 0x16b   :  { %108 = vsyncpa [#allocation3], 1 }
 0x16c   :  { %109 = vsyncpa [#allocation4], 1 }

</bundles_post_ra>
